<compile_context>
chip_gen: v6e
topology: v6e:2x2x1
jax: 0.10.0
libtpu: 0.0.40
codegen_flags: <defaults>
</compile_context>

<pallas_src>
import functools

import jax
import jax.numpy as jnp
from jax.experimental import pallas as pl
from jax.experimental.pallas import tpu as pltpu


def _layer_norm_kernel(x_ref, w_ref, b_ref, o_ref, *, eps: float, inv_d: float):
    # x_ref: (tr, D), w_ref/b_ref: (1, D), o_ref: (tr, D)
    x = x_ref[...].astype(jnp.float32)
    # sum * (1/D) instead of mean(): avoids per-tile VPU divides.
    mean = jnp.sum(x, axis=-1, keepdims=True) * inv_d
    xc = x - mean
    # Biased variance, matching F.layer_norm.
    var = jnp.sum(xc * xc, axis=-1, keepdims=True) * inv_d
    inv = jax.lax.rsqrt(var + eps)                      # EUP
    w = w_ref[...].astype(jnp.float32)                  # (1, D) -> broadcast over rows
    b = b_ref[...].astype(jnp.float32)
    o_ref[...] = (xc * inv * w + b).astype(o_ref.dtype)


def _sublane_packing(dtype) -> int:
    # 8 for f32, 16 for bf16/f16, 32 for int8/fp8.
    itemsize = jnp.dtype(dtype).itemsize
    return max(8, 32 // max(itemsize, 1))


def layer_norm(x: jax.Array, weight: jax.Array, bias: jax.Array,
               eps: float = 1e-5, *, target_block_bytes: int = 4 << 20) -> jax.Array:
    """LayerNorm over the last dim of x (any leading shape)."""
    orig_shape = x.shape
    d = orig_shape[-1]
    assert weight.shape == (d,) and bias.shape == (d,)

    x2 = x.reshape(-1, d)          # free view reshape (contiguous, row-major)
    r = x2.shape[0]

    itemsize = jnp.dtype(x.dtype).itemsize
    pack = _sublane_packing(x.dtype)

    # Row tile: ~target_block_bytes of input per block, multiple of the
    # sublane packing.  Clamped to R (full-dim block is always a legal block
    # shape regardless of the (8,128) rule).
    tr = (target_block_bytes // max(d * itemsize, 1)) // pack * pack
    tr = max(pack, tr)
    if tr >= r:
        tr = r
    grid = pl.cdiv(r, tr)

    # VMEM budget: double-buffered input + output blocks + params (x2 each).
    block_bytes = tr * d * itemsize
    param_bytes = d * (jnp.dtype(weight.dtype).itemsize
                       + jnp.dtype(bias.dtype).itemsize)
    vmem_needed = 4 * block_bytes + 2 * param_bytes
    # Raise the scoped limit above v5e's 16 MiB default, leave headroom, and
    # never exceed v7x's 64 MiB physical VMEM.
    vmem_limit = int(min(64 << 20, max(32 << 20, 2 * vmem_needed)))

    w2 = weight.reshape(1, d)
    b2 = bias.reshape(1, d)

    out = pl.pallas_call(
        functools.partial(_layer_norm_kernel, eps=float(eps), inv_d=1.0 / d),
        out_shape=jax.ShapeDtypeStruct((r, d), x.dtype),
        grid_spec=pltpu.PrefetchScalarGridSpec(
            num_scalar_prefetch=0,
            grid=(grid,),
            in_specs=[
                pl.BlockSpec((tr, d), lambda i: (i, 0)),
                pl.BlockSpec((1, d), lambda i: (0, 0)),
                pl.BlockSpec((1, d), lambda i: (0, 0)),
            ],
            out_specs=pl.BlockSpec((tr, d), lambda i: (i, 0)),
        ),
        compiler_params=pltpu.CompilerParams(
            dimension_semantics=("parallel",),
            vmem_limit_bytes=vmem_limit,
        ),
    )(x2, w2, b2)

    return out.reshape(orig_shape)


if __name__ == "__main__":
    # Module: LayerNorm(dim=32, eps=1e-5); input (batch=2, seq=8, hidden=32)
    dim = 32
    eps = 1e-5

    key = jax.random.PRNGKey(0)
    kx, kw, kb = jax.random.split(key, 3)

    x = jax.random.normal(kx, (2, 8, dim), dtype=jnp.float32)
    # Deterministic "parameters" (torch.empty in __init__ is uninitialized).
    weight = jax.random.normal(kw, (dim,), dtype=jnp.float32)
    bias = jax.random.normal(kb, (dim,), dtype=jnp.float32)

    y = layer_norm(x, weight, bias, eps)
    y = jax.block_until_ready(y)

    # Pure-JAX reference check.
    mean = jnp.mean(x, axis=-1, keepdims=True)
    var = jnp.mean((x - mean) ** 2, axis=-1, keepdims=True)
    ref = (x - mean) * jax.lax.rsqrt(var + eps) * weight + bias
    assert jnp.allclose(y, ref, atol=1e-5, rtol=1e-5), "mismatch vs reference"

    print("KERNEL_OK")
</pallas_src>

<mosaic_0001>
module attributes {stable_mosaic.version = 11 : i64} {
  func.func @_layer_norm_kernel(%arg0: i32, %arg1: memref<16x32xf32, #tpu.memory_space<vmem>>, %arg2: memref<1x32xf32, #tpu.memory_space<vmem>>, %arg3: memref<1x32xf32, #tpu.memory_space<vmem>>, %arg4: memref<16x32xf32, #tpu.memory_space<vmem>>) attributes {dimension_semantics = [#tpu.dimension_semantics<parallel>], iteration_bounds = array<i64: 1>, scalar_prefetch = 0 : i64, scratch_operands = 0 : i64, tpu.core_type = #tpu.core_type<tc>, window_params = [{transform_indices = @transform_0, window_bounds = array<i64: 16, 32>}, {pipeline_mode = #tpu.pipeline_mode<synchronous>, transform_indices = @transform_1, window_bounds = array<i64: 1, 32>}, {pipeline_mode = #tpu.pipeline_mode<synchronous>, transform_indices = @transform_2, window_bounds = array<i64: 1, 32>}, {transform_indices = @transform_3, window_bounds = array<i64: 16, 32>}]} {
    %c0 = arith.constant 0 : index
    %c0_0 = arith.constant 0 : index
    %0 = vector.load %arg1[%c0, %c0_0] : memref<16x32xf32, #tpu.memory_space<vmem>>, vector<16x32xf32>
    %cst = arith.constant dense<0.000000e+00> : vector<16xf32>
    %1 = vector.multi_reduction <add>, %0, %cst [1] : vector<16x32xf32> to vector<16xf32>
    %2 = vector.shape_cast %1 : vector<16xf32> to vector<16x1xf32>
    %cst_1 = arith.constant 3.125000e-02 : f32
    %3 = vector.broadcast %cst_1 : f32 to vector<16x1xf32>
    %4 = arith.mulf %2, %3 : vector<16x1xf32>
    %5 = vector.broadcast %4 : vector<16x1xf32> to vector<16x32xf32>
    %6 = arith.subf %0, %5 : vector<16x32xf32>
    %7 = arith.mulf %6, %6 : vector<16x32xf32>
    %cst_2 = arith.constant dense<0.000000e+00> : vector<16xf32>
    %8 = vector.multi_reduction <add>, %7, %cst_2 [1] : vector<16x32xf32> to vector<16xf32>
    %9 = vector.shape_cast %8 : vector<16xf32> to vector<16x1xf32>
    %cst_3 = arith.constant 3.125000e-02 : f32
    %10 = vector.broadcast %cst_3 : f32 to vector<16x1xf32>
    %11 = arith.mulf %9, %10 : vector<16x1xf32>
    %cst_4 = arith.constant 9.99999974E-6 : f32
    %12 = vector.broadcast %cst_4 : f32 to vector<16x1xf32>
    %13 = arith.addf %11, %12 : vector<16x1xf32>
    %14 = math.rsqrt %13 : vector<16x1xf32>
    %c0_5 = arith.constant 0 : index
    %c0_6 = arith.constant 0 : index
    %15 = vector.load %arg2[%c0_5, %c0_6] : memref<1x32xf32, #tpu.memory_space<vmem>>, vector<1x32xf32>
    %c0_7 = arith.constant 0 : index
    %c0_8 = arith.constant 0 : index
    %16 = vector.load %arg3[%c0_7, %c0_8] : memref<1x32xf32, #tpu.memory_space<vmem>>, vector<1x32xf32>
    %17 = vector.broadcast %14 : vector<16x1xf32> to vector<16x32xf32>
    %18 = arith.mulf %6, %17 : vector<16x32xf32>
    %19 = vector.broadcast %15 : vector<1x32xf32> to vector<16x32xf32>
    %20 = arith.mulf %18, %19 : vector<16x32xf32>
    %21 = vector.broadcast %16 : vector<1x32xf32> to vector<16x32xf32>
    %22 = arith.addf %20, %21 : vector<16x32xf32>
    %c0_9 = arith.constant 0 : index
    %c0_10 = arith.constant 0 : index
    %23 = vector.load %arg4[%c0_9, %c0_10] : memref<16x32xf32, #tpu.memory_space<vmem>>, vector<16x32xf32>
    tpu.vector_store %arg4[%c0_9, %c0_10], %22 {strides = array<i32>} : memref<16x32xf32, #tpu.memory_space<vmem>>, vector<16x32xf32>,
    return
  }
  func.func @transform_0(%arg0: i32) -> (i32, i32) {
    %c0_i32 = arith.constant 0 : i32
    %c0_i32_0 = arith.constant 0 : i32
    return %arg0, %c0_i32 : i32, i32
  }
  func.func @transform_1(%arg0: i32) -> (i32, i32) {
    %c0_i32 = arith.constant 0 : i32
    %c0_i32_0 = arith.constant 0 : i32
    %c0_i32_1 = arith.constant 0 : i32
    return %c0_i32, %c0_i32_0 : i32, i32
  }
  func.func @transform_2(%arg0: i32) -> (i32, i32) {
    %c0_i32 = arith.constant 0 : i32
    %c0_i32_0 = arith.constant 0 : i32
    %c0_i32_1 = arith.constant 0 : i32
    return %c0_i32, %c0_i32_0 : i32, i32
  }
  func.func @transform_3(%arg0: i32) -> (i32, i32) {
    %c0_i32 = arith.constant 0 : i32
    %c0_i32_0 = arith.constant 0 : i32
    return %arg0, %c0_i32 : i32, i32
  }
}

</mosaic_0001>

<bundles_post_ra>
// kernel: tpu_custom_call.1
= control target key start
LH: loop header
LB: loop body
LE: loop exit
PB: predicated region body
PF: predicated region fallthrough
CT: control target
= control target key end

     0   :  { %8 = vsyncpa [#allocation3], 0  ;;  %s197_s0 = inlined_call_operand.hbm [shape: f32[16,32], index: 0, kind: input, shape index: {}]   ;;  %s198_s1 = inlined_call_operand.vmem [shape: f32[1,32], index: 1, kind: input, shape index: {}]   ;;  %s199_s2 = inlined_call_operand.vmem [shape: f32[1,32], index: 2, kind: input, shape index: {}]   ;;  %s200_s3 = inlined_call_operand.hbm [shape: f32[16,32], index: 3, kind: output, shape index: {}]  }
   0x1   :  { %9 = vsyncpa [#allocation4], 0  ;;  %s149_s12 = smov [#allocation2]  }
   0x2   :  { %s15_s13 = sshll.u32 %s149_s12, 4  ;;  %s16_s13 = int_to_ptr.vmem [resolvable:$true] %s15_s13 }
   0x3   :  { %s113_s14 = scalar_lea.vmem %s16_s13, 256  ;;  %p118_p1 = scmp.lt.s32.totalorder %s16_s13, %s16_s13 }
   0x4   :  { %p114_p0 = scmp.ne.s32.totalorder %s16_s13, %s113_s14  ;;  %p119_p2 = scmp.lt.s32.totalorder %s113_s14, %s113_s14 }
   0x6   :  { %p120_p3 = por %p119_p2, %p118_p1 }
   0x8   :  { %p121_p4 = pnand %p120_p3, %p114_p0 }
   0xa   :  { %124 = shalt.err (!%p121_p4)
}
   0xb   :  { %s150_s15 = smov 128   ;;  %s151_s16 = smov 8  }
   0xc   :  { %21 = dma.hbm_to_vmem [thread:$0]  %s197_s0, 256, %s16_s13, [#allocation3], %s150_s15, %s150_s15, %s151_s16  }
   0xd   :  { %145 = dma.done.wait [#allocation3], 256  }
   0xe   :  { %146 = vsyncadd [#allocation3], 4294967040  ;;  %vm31_vm0 = vcmask 261120   ;;  %v29_v0 = vld [vmem:[#allocation2] sm:$0xff]  ;;  %v30_v1 = vld [vmem:[#allocation2 + $0x8] sm:$0xff]  ;;  %s152_s22 = smov [#allocation5]  }
   0xf   :  { %v32_v2 = vsel %vm31_vm0, %v29_v0, 0.0  ;;  %v35_v3 = vsel %vm31_vm0, %v30_v1, 0.0  ;;  %v95_v21 = vld [vmem:[%s198_s1] ss:$0 sm:$0xff]  ;;  %s83_s23 = sshll.u32 %s152_s22, 4  ;;  %s84_s23 = int_to_ptr.vmem [resolvable:$true] %s83_s23 }
  0x10   :  { %33 = vadd.xlane.f32.xlu0 %v32_v2  ;;  %v96_v23 = vld [vmem:[%s199_s2] ss:$0 sm:$0xff]  ;;  %s125_s24 = scalar_lea.vmem %s84_s23, 256  ;;  %p130_p6 = scmp.lt.s32.totalorder %s84_s23, %s84_s23 }
  0x11   :  { %p126_p5 = scmp.ne.s32.totalorder %s84_s23, %s125_s24  ;;  %p131_p7 = scmp.lt.s32.totalorder %s125_s24, %s125_s24 }
  0x13   :  { %p132_p8 = por %p131_p7, %p130_p6 }
  0x14   :  { %36 = vadd.xlane.f32.xlu0 %v35_v3 }
  0x15   :  { %p133_p9 = pnand %p132_p8, %p126_p5 }
  0x99   :  { %v34_v4 = vpop.xlane.xlu0 %33 }
  0x9a   :  { %v38_v5 = vmul.f32 0.03125, %v34_v4 }
  0x9c   :  { %v40_v6 = vsub.f32 %v29_v0, %v38_v5 }
  0x9d   :  { %v37_v7 = vpop.xlane.xlu0 %36 }
  0x9e   :  { %v39_v8 = vmul.f32 0.03125, %v37_v7  ;;  %v42_v9 = vmul.f32 %v40_v6, %v40_v6 }
  0xa0   :  { %v41_v10 = vsub.f32 %v30_v1, %v39_v8  ;;  %v44_v11 = vsel %vm31_vm0, %v42_v9, 0.0 }
  0xa1   :  { %45 = vadd.xlane.f32.xlu1 %v44_v11 }
  0xa2   :  { %v43_v12 = vmul.f32 %v41_v10, %v41_v10 }
  0xa4   :  { %v47_v13 = vsel %vm31_vm0, %v43_v12, 0.0 }
  0xa5   :  { %48 = vadd.xlane.f32.xlu1 %v47_v13 }
 0x12a   :  { %v46_v14 = vpop.xlane.xlu1 %45 }
 0x12b   :  { %v50_v15 = vmul.f32 0.03125, %v46_v14 }
 0x12d   :  { %v52_v16 = vadd.f32 1e-05, %v50_v15 }
 0x12e   :  { %v49_v17 = vpop.xlane.xlu1 %48 }
 0x12f   :  { %101 = vrsqrt.f32 %v52_v16  ;;  %v51_v18 = vmul.f32 0.03125, %v49_v17 }
 0x131   :  { %v53_v19 = vadd.f32 1e-05, %v51_v18 }
 0x133   :  { %103 = vrsqrt.f32 %v53_v19 }
 0x13c   :  { %v102_v20 = vpop.eup %101 }
 0x13d   :  { %v58_v22 = vmul.f32 %v102_v20, %v40_v6 }
 0x13f   :  { %v66_v24 = vmul.f32 %v95_v21, %v58_v22 }
 0x140   :  { %v104_v25 = vpop.eup %103 }
 0x141   :  { %v59_v26 = vmul.f32 %v104_v25, %v41_v10  ;;  %v74_v27 = vadd.f32 %v96_v23, %v66_v24 }
 0x143   :  { %v67_v28 = vmul.f32 %v95_v21, %v59_v26  ;;  %76 = vst.msk [vmem:[#allocation5] sm:$0xff] %vm31_vm0, %v74_v27 }
 0x145   :  { %v75_v29 = vadd.f32 %v96_v23, %v67_v28 }
 0x147   :  { %77 = vst.msk [vmem:[#allocation5 + $0x8] sm:$0xff] %vm31_vm0, %v75_v29 }
 0x148   :  { %136 = shalt.err (!%p133_p9)
}
 0x149   :  { %89 = dma.vmem_to_hbm [thread:$0]  %s84_s23, 256, %s200_s3, [#allocation4], %s150_s15, %s150_s15, %s151_s16  }
 0x14a   :  { %147 = dma.done.wait [#allocation4], 256  }
 0x14b   :  { %148 = vsyncadd [#allocation4], 4294967040 }
 0x14c   :  { %93 = vsyncpa [#allocation3], 1 }
 0x14d   :  { %94 = vsyncpa [#allocation4], 1 }

</bundles_post_ra>
